<compile_context>
chip_gen: v5e
topology: v5e:2x2
jax: 0.10.0
libtpu: 0.0.40
codegen_flags: <defaults>
</compile_context>

<pallas_src>
import jax
import jax.numpy as jnp
from jax.experimental import pallas as pl
from jax.experimental.pallas import tpu as pltpu


def fea_kernel(x_ref, w_ref, b_ref, o_ref):
    # One fused MXU matmul (block-diagonal weight) + one VPU bias add +
    # one full-tile store.  f32 accumulation via preferred_element_type.
    o_ref[...] = (
        jnp.dot(x_ref[...], w_ref[...], preferred_element_type=jnp.float32)
        + b_ref[...]
    ).astype(o_ref.dtype)


def fea_forward(x0, x1, w0, b0, w1, b1, *, batch_tile=256):
    """Equivalent of Fea.forward(x0, x1) for the two-Linear instantiation.

    == concatenate([x0 @ w0 + b0, squeeze(x1, 1) @ w1 + b1], axis=1)
    """
    # torch.squeeze(p, 1) is applied to 3-D non-first inputs only.
    if x1.ndim == 3:
        x1 = jnp.squeeze(x1, 1)

    B = x0.shape[0]
    D0, F0 = w0.shape
    D1, F1 = w1.shape
    Dc, Fc = D0 + D1, F0 + F1

    # --- arg prep: fuse the two Linears into a single matmul -----------------
    # Block-diagonal weight: w0 top-left, w1 bottom-right, zeros elsewhere.
    w_cat = jnp.zeros((Dc, Fc), jnp.float32)
    w_cat = w_cat.at[:D0, :F0].set(w0.astype(jnp.float32))
    w_cat = w_cat.at[D0:, F0:].set(w1.astype(jnp.float32))
    b_cat = jnp.concatenate(
        [b0.reshape(1, F0), b1.reshape(1, F1)], axis=1
    ).astype(jnp.float32)
    # Concatenated activations (B, D0+D1): one input stream, one MXU pass.
    x_cat = jnp.concatenate(
        [x0.astype(jnp.float32), x1.astype(jnp.float32)], axis=1
    )

    # --- batch grid: sublane-aligned tile, pad B if needed -------------------
    tb = min(batch_tile, max(8, B))
    tb = (tb + 7) // 8 * 8                      # multiple of 8 (sublanes)
    n_blocks = pl.cdiv(B, tb)
    b_pad = n_blocks * tb
    if b_pad != B:
        x_cat = jnp.pad(x_cat, ((0, b_pad - B), (0, 0)))

    out = pl.pallas_call(
        fea_kernel,
        out_shape=jax.ShapeDtypeStruct((b_pad, Fc), jnp.float32),
        grid=(n_blocks,),
        in_specs=[
            pl.BlockSpec((tb, Dc), lambda i: (i, 0)),   # activations: tiled over B
            pl.BlockSpec((Dc, Fc), lambda i: (0, 0)),   # fused weight: grid-invariant
            pl.BlockSpec((1, Fc), lambda i: (0, 0)),    # fused bias:  grid-invariant
        ],
        out_specs=pl.BlockSpec((tb, Fc), lambda i: (i, 0)),
        compiler_params=pltpu.CompilerParams(
            dimension_semantics=("parallel",)),         # lets v7x use both TCs
    )(x_cat, w_cat, b_cat)

    return out[:B] if b_pad != B else out


def init_linear_params(key, in_features, out_features):
    # Deterministic init mimicking PyTorch's default Linear init
    # (uniform in [-1/sqrt(in), 1/sqrt(in)]).  Weight stored as (in, out).
    kw, kb = jax.random.split(key)
    bound = 1.0 / jnp.sqrt(jnp.float32(in_features))
    w = jax.random.uniform(kw, (in_features, out_features), jnp.float32,
                           minval=-bound, maxval=bound)
    b = jax.random.uniform(kb, (1, out_features), jnp.float32,
                           minval=-bound, maxval=bound)
    return w, b


if __name__ == "__main__":
    key = jax.random.PRNGKey(0)
    k0, k1, kx0, kx1 = jax.random.split(key, 4)

    B, D0, F0 = 8, 32, 16   # f_0: nn.Linear(32, 16)
    D1, F1 = 24, 16         # f_1: nn.Linear(24, 16)

    w0, b0 = init_linear_params(k0, D0, F0)
    w1, b1 = init_linear_params(k1, D1, F1)

    x0 = jax.random.normal(kx0, (B, D0), jnp.float32)
    x1 = jax.random.normal(kx1, (B, 1, D1), jnp.float32)  # 3-D -> squeezed on dim 1

    y = jax.block_until_ready(fea_forward(x0, x1, w0, b0, w1, b1))

    # Pure-JAX reference of the PyTorch semantics.
    ref = jnp.concatenate(
        [x0 @ w0 + b0, jnp.squeeze(x1, 1) @ w1 + b1], axis=1)
    assert y.shape == (B, F0 + F1)
    assert jnp.allclose(y, ref, atol=1e-5, rtol=1e-5)

    print("KERNEL_OK")
</pallas_src>

<mosaic_0001>
module attributes {stable_mosaic.version = 11 : i64} {
  func.func @fea_kernel(%arg0: i32, %arg1: memref<8x56xf32, #tpu.memory_space<vmem>>, %arg2: memref<56x32xf32, #tpu.memory_space<vmem>>, %arg3: memref<1x32xf32, #tpu.memory_space<vmem>>, %arg4: memref<8x32xf32, #tpu.memory_space<vmem>>) attributes {dimension_semantics = [#tpu.dimension_semantics<parallel>], iteration_bounds = array<i64: 1>, scalar_prefetch = 0 : i64, scratch_operands = 0 : i64, tpu.core_type = #tpu.core_type<tc>, window_params = [{transform_indices = @transform_0, window_bounds = array<i64: 8, 56>}, {pipeline_mode = #tpu.pipeline_mode<synchronous>, transform_indices = @transform_1, window_bounds = array<i64: 56, 32>}, {pipeline_mode = #tpu.pipeline_mode<synchronous>, transform_indices = @transform_2, window_bounds = array<i64: 1, 32>}, {transform_indices = @transform_3, window_bounds = array<i64: 8, 32>}]} {
    %c0 = arith.constant 0 : index
    %c0_0 = arith.constant 0 : index
    %0 = vector.load %arg1[%c0, %c0_0] : memref<8x56xf32, #tpu.memory_space<vmem>>, vector<8x56xf32>
    %c0_1 = arith.constant 0 : index
    %c0_2 = arith.constant 0 : index
    %1 = vector.load %arg2[%c0_1, %c0_2] : memref<56x32xf32, #tpu.memory_space<vmem>>, vector<56x32xf32>
    %cst = arith.constant dense<0.000000e+00> : vector<8x32xf32>
    %2 = tpu.matmul %0, %1, %cst {dimension_numbers = #tpu.dot_dimension_numbers<[1], [0], [0], [1], [0, 0, 1, 1], [], []>} : vector<8x56xf32>, vector<56x32xf32>, vector<8x32xf32> -> vector<8x32xf32>
    %c0_3 = arith.constant 0 : index
    %c0_4 = arith.constant 0 : index
    %3 = vector.load %arg3[%c0_3, %c0_4] : memref<1x32xf32, #tpu.memory_space<vmem>>, vector<1x32xf32>
    %4 = vector.broadcast %3 : vector<1x32xf32> to vector<8x32xf32>
    %5 = arith.addf %2, %4 : vector<8x32xf32>
    %c0_5 = arith.constant 0 : index
    %c0_6 = arith.constant 0 : index
    %6 = vector.load %arg4[%c0_5, %c0_6] : memref<8x32xf32, #tpu.memory_space<vmem>>, vector<8x32xf32>
    tpu.vector_store %arg4[%c0_5, %c0_6], %5 {strides = array<i32>} : memref<8x32xf32, #tpu.memory_space<vmem>>, vector<8x32xf32>,
    return
  }
  func.func @transform_0(%arg0: i32) -> (i32, i32) {
    %c0_i32 = arith.constant 0 : i32
    %c0_i32_0 = arith.constant 0 : i32
    return %arg0, %c0_i32 : i32, i32
  }
  func.func @transform_1(%arg0: i32) -> (i32, i32) {
    %c0_i32 = arith.constant 0 : i32
    %c0_i32_0 = arith.constant 0 : i32
    %c0_i32_1 = arith.constant 0 : i32
    return %c0_i32, %c0_i32_0 : i32, i32
  }
  func.func @transform_2(%arg0: i32) -> (i32, i32) {
    %c0_i32 = arith.constant 0 : i32
    %c0_i32_0 = arith.constant 0 : i32
    %c0_i32_1 = arith.constant 0 : i32
    return %c0_i32, %c0_i32_0 : i32, i32
  }
  func.func @transform_3(%arg0: i32) -> (i32, i32) {
    %c0_i32 = arith.constant 0 : i32
    %c0_i32_0 = arith.constant 0 : i32
    return %arg0, %c0_i32 : i32, i32
  }
}

</mosaic_0001>

<bundles_post_ra>
// kernel: tpu_custom_call.1
= control target key start
LH: loop header
LB: loop body
LE: loop exit
PB: predicated region body
PF: predicated region fallthrough
CT: control target
= control target key end

     0   :  { %s149_s0 = inlined_call_operand.vmem [shape: f32[8,56], index: 0, kind: input, shape index: {}]   ;;  %s150_s1 = inlined_call_operand.vmem [shape: f32[56,32], index: 1, kind: input, shape index: {}]   ;;  %s151_s2 = inlined_call_operand.vmem [shape: f32[1,32], index: 2, kind: input, shape index: {}]   ;;  %s152_s3 = inlined_call_operand.hbm [shape: f32[8,32], index: 3, kind: output, shape index: {}]  }
   0x1   :  { %v22_v0 = vld [vmem:[%s150_s1 + $0x30] sm:$0xff]  ;;  %v21_v1 = vld [vmem:[%s150_s1 + $0x28] sm:$0xff]  ;;  %v20_v2 = vld [vmem:[%s150_s1 + $0x20] sm:$0xff] }
   0x2   :  { %40 = vmatpush.msra.mxu0 %v22_v0 }
   0x4   :  { %41 = vmatpush.msra.mxu0 %v21_v1 }
   0x5   :  { %8 = vsyncpa [#allocation3], 0  ;;  %v19_v3 = vld [vmem:[%s150_s1 + $0x18] sm:$0xff]  ;;  %v18_v4 = vld [vmem:[%s150_s1 + $0x10] sm:$0xff]  ;;  %vm27_vm0 = vcmask 457728   ;;  %s98_s30 = smov [#allocation2]  }
   0x6   :  { %42 = vmatpush.msra.mxu0 %v20_v2  ;;  %v17_v5 = vld [vmem:[%s150_s1 + $0x8] sm:$0xff]  ;;  %v16_v6 = vld [vmem:[%s150_s1] sm:$0xff]  ;;  %s58_s4 = sshll.u32 %s98_s30, 4  ;;  %s60_s7 = sshll.u32 %s152_s3, 4  ;;  %vm51_vm1 = vcmask 261120   ;;  %s59_s4 = int_to_ptr.vmem [resolvable:$true] %s58_s4  ;;  %s61_s7 = int_to_ptr.hbm [resolvable:$true] %s60_s7 }
   0x7   :  { %v15_v7 = vld [vmem:[%s149_s0] sm:$0xff] }
   0x8   :  { %43 = vmatpush.msra.mxu0 %v19_v3  ;;  %v71_v8 = vld [vmem:[%s151_s2] ss:$0 sm:$0xff] }
   0xa   :  { %44 = vmatpush.msra.mxu0 %v18_v4 }
   0xc   :  { %45 = vmatpush.msra.mxu0 %v17_v5 }
   0xe   :  { %46 = vmatpush.msra.mxu0 %v16_v6 }
   0xf   :  { %69 = vmatmul.msk.f32.vlgmr.msra.gmra.mxu0 %vm27_vm0, %v15_v7 }
  0x8c   :  { %v48_v9 = vpop.f32.mrf.mxu0 }
  0x8d   :  { %v49_v10 = vadd.f32 %v71_v8, %v48_v9 }
  0x8f   :  { %52 = vst.msk [vmem:[#allocation2] sm:$0xff] %vm51_vm1, %v49_v10 }
  0x90   :  { %63 = dma.vmem_to_hbm [thread:$0]  %s59_s4, 128, %s61_s7, [#allocation3]  }
  0x91   :  { %96 = dma.done.wait [#allocation3], 128  }
  0x92   :  { %97 = vsyncadd [#allocation3], 4294967168 }
  0x93   :  { %68 = vsyncpa [#allocation3], 1 }

</bundles_post_ra>
